<compile_context>
chip_gen: v7x
topology: tpu7x:2x2x1
jax: 0.10.0
libtpu: 0.0.40
codegen_flags: <defaults>
</compile_context>

<pallas_src>
import functools

import jax
import jax.numpy as jnp
import numpy as np
from jax.experimental import pallas as pl
from jax.experimental.pallas import tpu as pltpu


def _residual_block_kernel(x_ref, w1_ref, b1_ref, w3_ref, b2_ref, wtail_ref,
                           mask_ref, o_ref, *, n_img, height, width):
    """Channel-on-sublane / (batch*pixel)-on-lane layout: activations are
    (C, N*H*W) so matmuls are maximally wide and every store is lane-dense."""
    hw = height * width
    nhw = n_img * hw

    # Fold batch onto the lane axis: (N, Cin, HW) -> (Cin, N*HW).
    # Static leading-dim indexing + one lane concat of 128-aligned pieces.
    x = jnp.concatenate([x_ref[n] for n in range(n_img)], axis=1)
    x = x.astype(jnp.float32)

    # --- conv1x1 -> BN -> ReLU.  BN1 scale folded into rows of w1; only
    #     bias-add + ReLU remain here.
    y = jnp.dot(w1_ref[...], x, preferred_element_type=jnp.float32)
    y = jnp.maximum(y + b1_ref[...], 0.0)                      # (Cin, N*HW)

    # --- conv3x3 (stride 1, pad 1) as ONE im2col matmul: 9 rolled+masked taps
    #     stacked on sublanes -> (9*Cin, N*HW), times (Cin, 9*Cin) weights.
    #     Masks are precomputed per-image, so rolls wrapping across image (or
    #     global) boundaries are zeroed.  BN2 scale folded into w3.
    taps = []
    m_idx = 0
    for dy in (-1, 0, 1):
        for dx in (-1, 0, 1):
            off = dy * width + dx
            if off == 0:
                taps.append(y)
            else:
                shifted = pltpu.roll(y, shift=(-off) % nhw, axis=1)
                taps.append(shifted * mask_ref[pl.ds(m_idx, 1), :])
                m_idx += 1
    cols = jnp.concatenate(taps, axis=0)                       # (9*Cin, N*HW)
    y2 = jnp.dot(w3_ref[...], cols, preferred_element_type=jnp.float32)
    y2 = jnp.maximum(y2 + b2_ref[...], 0.0)                    # (Cin, N*HW)

    # --- final residual 1x1 conv + identity 1x1 conv fused into one matmul:
    #     [w5 | wid] @ [y2 ; x]
    tail = jnp.concatenate([y2, x], axis=0)                    # (2*Cin, N*HW)
    out = jnp.dot(wtail_ref[...], tail, preferred_element_type=jnp.float32)

    # Split the lane axis back per image; each store is a lane-dense
    # (Cout, HW) slab at a static 128-aligned offset.
    for n in range(n_img):
        o_ref[n] = out[:, n * hw:(n + 1) * hw].astype(o_ref.dtype)


def _build_tap_masks(n_img, height, width):
    """(8, N*H*W) float32 validity masks for the 8 non-center 3x3 taps, in
    (dy, dx) row-major order, computed from per-image coordinates."""
    hw = height * width
    pos = np.arange(n_img * hw) % hw
    row, col = pos // width, pos % width
    top = row >= 1
    bot = row < height - 1
    left = col >= 1
    right = col < width - 1
    masks = []
    for dy in (-1, 0, 1):
        for dx in (-1, 0, 1):
            if dy == 0 and dx == 0:
                continue
            ok = np.ones(n_img * hw, dtype=bool)
            if dy == -1:
                ok &= top
            elif dy == 1:
                ok &= bot
            if dx == -1:
                ok &= left
            elif dx == 1:
                ok &= right
            masks.append(ok)
    return jnp.asarray(np.stack(masks).astype(np.float32))


def prepare_params(p):
    """One-time parameter prep: fold BN scales into conv weights (exact, since
    scale precedes bias+ReLU) and flatten to kernel-ready lane-dense 2-D
    layouts."""
    cin = p["w1"].shape[0]
    w1f = p["w1"] * p["s1"]                                    # (Cin, Cin) row-scaled
    w3s = p["w3"] * p["s2"].reshape(1, 1, cin, 1)              # scale out-channel
    # (3,3,O,I) -> (O, 3*3*I): column block t = (dy+1)*3+(dx+1) holds tap (dy,dx).
    w3f = jnp.transpose(w3s, (2, 0, 1, 3)).reshape(cin, 9 * cin)
    wtail = jnp.concatenate([p["w5"], p["wid"]], axis=1)       # (Cout, 2*Cin)
    return dict(w1=w1f, b1=p["b1"], w3=w3f, b2=p["b2"], wtail=wtail)


def residual_block_sample(x_nchw, prep):
    """x_nchw: [N, Cin, H, W] float32 (PyTorch layout). Returns [N, Cout, H, W]."""
    N, Cin, H, W = x_nchw.shape
    HW = H * W
    Cout = prep["wtail"].shape[0]
    x = x_nchw.reshape(N, Cin, HW)                             # free reshape
    masks = _build_tap_masks(N, H, W)

    kernel = functools.partial(_residual_block_kernel,
                               n_img=N, height=H, width=W)

    # Single invocation, no grid: total VMEM footprint is tiny (<100 KB), so we
    # avoid all per-step pipeline overhead.  On v7x this runs on one
    # TensorCore; at this problem size splitting N back out would reintroduce
    # per-step overhead and halve the matmul lane width, so single-TC is the
    # right trade.
    out = pl.pallas_call(
        kernel,
        out_shape=jax.ShapeDtypeStruct((N, Cout, HW), x_nchw.dtype),
    )(x, prep["w1"], prep["b1"], prep["w3"], prep["b2"], prep["wtail"], masks)

    return out.reshape(N, Cout, H, W)                          # free reshape


def make_params(key, cin, cout):
    """Deterministic init. Conv weights stored as [O, I] / [kh, kw, O, I];
    BatchNorm folded into per-channel (C, 1) scale/bias (inference mode)."""
    ks = jax.random.split(key, 10)
    eps = 1e-5

    w1 = jax.random.normal(ks[0], (cin, cin), jnp.float32) * 0.2        # [O, I]
    w3 = jax.random.normal(ks[1], (3, 3, cin, cin), jnp.float32) * 0.1  # [kh, kw, O, I]
    w5 = jax.random.normal(ks[2], (cout, cin), jnp.float32) * 0.2       # [O, I]
    wid = jax.random.normal(ks[3], (cout, cin), jnp.float32) * 0.2      # [O, I]

    g1 = 1.0 + 0.1 * jax.random.normal(ks[4], (cin,), jnp.float32)
    be1 = 0.1 * jax.random.normal(ks[5], (cin,), jnp.float32)
    m1 = 0.1 * jax.random.normal(ks[6], (cin,), jnp.float32)
    v1 = 1.0 + 0.1 * jnp.abs(jax.random.normal(ks[7], (cin,), jnp.float32))

    g2 = 1.0 + 0.1 * jax.random.normal(ks[8], (cin,), jnp.float32)
    be2 = 0.1 * jax.random.normal(ks[9], (cin,), jnp.float32)
    m2 = jnp.zeros((cin,), jnp.float32)
    v2 = jnp.ones((cin,), jnp.float32)

    s1 = g1 / jnp.sqrt(v1 + eps)
    b1 = be1 - m1 * s1
    s2 = g2 / jnp.sqrt(v2 + eps)
    b2 = be2 - m2 * s2

    return dict(w1=w1, w3=w3, w5=w5, wid=wid,
                s1=s1.reshape(cin, 1), b1=b1.reshape(cin, 1),
                s2=s2.reshape(cin, 1), b2=b2.reshape(cin, 1))


def _reference(x_nchw, p):
    """Pure-JAX reference (lax conv, NHWC/HWIO) for correctness checking."""
    x = jnp.transpose(x_nchw, (0, 2, 3, 1))

    def conv(a, w, pad):
        return jax.lax.conv_general_dilated(
            a, w, (1, 1), pad, dimension_numbers=("NHWC", "HWIO", "NHWC"))

    w1 = jnp.transpose(p["w1"])[None, None]                   # -> (1,1,I,O)
    w3 = jnp.transpose(p["w3"], (0, 1, 3, 2))                 # -> (3,3,I,O)
    w5 = jnp.transpose(p["w5"])[None, None]
    wid = jnp.transpose(p["wid"])[None, None]

    t = conv(x, w1, "VALID")
    t = jnp.maximum(t * p["s1"][:, 0] + p["b1"][:, 0], 0.0)
    t = conv(t, w3, [(1, 1), (1, 1)])
    t = jnp.maximum(t * p["s2"][:, 0] + p["b2"][:, 0], 0.0)
    res = conv(t, w5, "VALID")
    ident = conv(x, wid, "VALID")
    return jnp.transpose(ident + res, (0, 3, 1, 2))


if __name__ == "__main__":
    N, Cin, Cout, H, W = 2, 4, 8, 16, 16
    key = jax.random.PRNGKey(0)
    kx, kp = jax.random.split(key)
    x = jax.random.normal(kx, (N, Cin, H, W), jnp.float32)
    raw = make_params(kp, Cin, Cout)
    prep = prepare_params(raw)

    out = jax.block_until_ready(residual_block_sample(x, prep))

    ref = jax.block_until_ready(_reference(x, raw))
    np.testing.assert_allclose(np.asarray(out), np.asarray(ref),
                               rtol=5e-4, atol=5e-4)
    print("KERNEL_OK")
</pallas_src>

<mosaic_0001>
module attributes {stable_mosaic.version = 11 : i64} {
  func.func @_residual_block_kernel(%arg0: memref<2x4x256xf32, #tpu.memory_space<vmem>>, %arg1: memref<4x4xf32, #tpu.memory_space<vmem>>, %arg2: memref<4x1xf32, #tpu.memory_space<vmem>>, %arg3: memref<4x36xf32, #tpu.memory_space<vmem>>, %arg4: memref<4x1xf32, #tpu.memory_space<vmem>>, %arg5: memref<8x8xf32, #tpu.memory_space<vmem>>, %arg6: memref<8x512xf32, #tpu.memory_space<vmem>>, %arg7: memref<2x8x256xf32, #tpu.memory_space<vmem>>) attributes {dimension_semantics = [], scalar_prefetch = 0 : i64, scratch_operands = 0 : i64, tpu.core_type = #tpu.core_type<tc>} {
    %c0 = arith.constant 0 : index
    %c0_0 = arith.constant 0 : index
    %c0_1 = arith.constant 0 : index
    %0 = vector.load %arg0[%c0, %c0_0, %c0_1] : memref<2x4x256xf32, #tpu.memory_space<vmem>>, vector<1x4x256xf32>
    %1 = vector.shape_cast %0 : vector<1x4x256xf32> to vector<4x256xf32>
    %c1 = arith.constant 1 : index
    %c0_2 = arith.constant 0 : index
    %c0_3 = arith.constant 0 : index
    %2 = vector.load %arg0[%c1, %c0_2, %c0_3] : memref<2x4x256xf32, #tpu.memory_space<vmem>>, vector<1x4x256xf32>
    %3 = vector.shape_cast %2 : vector<1x4x256xf32> to vector<4x256xf32>
    %4 = tpu.concatenate %1, %3 in 1 : vector<4x256xf32>, vector<4x256xf32> -> vector<4x512xf32>
    %c0_4 = arith.constant 0 : index
    %c0_5 = arith.constant 0 : index
    %5 = vector.load %arg1[%c0_4, %c0_5] : memref<4x4xf32, #tpu.memory_space<vmem>>, vector<4x4xf32>
    %cst = arith.constant dense<0.000000e+00> : vector<4x512xf32>
    %6 = tpu.matmul %5, %4, %cst {dimension_numbers = #tpu.dot_dimension_numbers<[1], [0], [0], [1], [0, 0, 1, 1], [], []>} : vector<4x4xf32>, vector<4x512xf32>, vector<4x512xf32> -> vector<4x512xf32>
    %c0_6 = arith.constant 0 : index
    %c0_7 = arith.constant 0 : index
    %7 = vector.load %arg2[%c0_6, %c0_7] : memref<4x1xf32, #tpu.memory_space<vmem>>, vector<4x1xf32>
    %8 = vector.broadcast %7 : vector<4x1xf32> to vector<4x512xf32>
    %9 = arith.addf %6, %8 : vector<4x512xf32>
    %cst_8 = arith.constant 0.000000e+00 : f32
    %10 = vector.broadcast %cst_8 : f32 to vector<4x512xf32>
    %11 = arith.maximumf %9, %10 : vector<4x512xf32>
    %c17_i32 = arith.constant 17 : i32
    %12 = tpu.dynamic_rotate %11 by %c17_i32 dim 1 : vector<4x512xf32>, i32 -> vector<4x512xf32>
    %c0_9 = arith.constant 0 : index
    %c0_10 = arith.constant 0 : index
    %13 = vector.load %arg6[%c0_9, %c0_10] : memref<8x512xf32, #tpu.memory_space<vmem>>, vector<1x512xf32>
    %14 = vector.broadcast %13 : vector<1x512xf32> to vector<4x512xf32>
    %15 = arith.mulf %12, %14 : vector<4x512xf32>
    %c16_i32 = arith.constant 16 : i32
    %16 = tpu.dynamic_rotate %11 by %c16_i32 dim 1 : vector<4x512xf32>, i32 -> vector<4x512xf32>
    %c1_11 = arith.constant 1 : index
    %c0_12 = arith.constant 0 : index
    %17 = vector.load %arg6[%c1_11, %c0_12] : memref<8x512xf32, #tpu.memory_space<vmem>>, vector<1x512xf32>
    %18 = vector.broadcast %17 : vector<1x512xf32> to vector<4x512xf32>
    %19 = arith.mulf %16, %18 : vector<4x512xf32>
    %c15_i32 = arith.constant 15 : i32
    %20 = tpu.dynamic_rotate %11 by %c15_i32 dim 1 : vector<4x512xf32>, i32 -> vector<4x512xf32>
    %c2 = arith.constant 2 : index
    %c0_13 = arith.constant 0 : index
    %21 = vector.load %arg6[%c2, %c0_13] : memref<8x512xf32, #tpu.memory_space<vmem>>, vector<1x512xf32>
    %22 = vector.broadcast %21 : vector<1x512xf32> to vector<4x512xf32>
    %23 = arith.mulf %20, %22 : vector<4x512xf32>
    %c1_i32 = arith.constant 1 : i32
    %24 = tpu.dynamic_rotate %11 by %c1_i32 dim 1 : vector<4x512xf32>, i32 -> vector<4x512xf32>
    %c3 = arith.constant 3 : index
    %c0_14 = arith.constant 0 : index
    %25 = vector.load %arg6[%c3, %c0_14] : memref<8x512xf32, #tpu.memory_space<vmem>>, vector<1x512xf32>
    %26 = vector.broadcast %25 : vector<1x512xf32> to vector<4x512xf32>
    %27 = arith.mulf %24, %26 : vector<4x512xf32>
    %c511_i32 = arith.constant 511 : i32
    %28 = tpu.dynamic_rotate %11 by %c511_i32 dim 1 : vector<4x512xf32>, i32 -> vector<4x512xf32>
    %c4 = arith.constant 4 : index
    %c0_15 = arith.constant 0 : index
    %29 = vector.load %arg6[%c4, %c0_15] : memref<8x512xf32, #tpu.memory_space<vmem>>, vector<1x512xf32>
    %30 = vector.broadcast %29 : vector<1x512xf32> to vector<4x512xf32>
    %31 = arith.mulf %28, %30 : vector<4x512xf32>
    %c497_i32 = arith.constant 497 : i32
    %32 = tpu.dynamic_rotate %11 by %c497_i32 dim 1 : vector<4x512xf32>, i32 -> vector<4x512xf32>
    %c5 = arith.constant 5 : index
    %c0_16 = arith.constant 0 : index
    %33 = vector.load %arg6[%c5, %c0_16] : memref<8x512xf32, #tpu.memory_space<vmem>>, vector<1x512xf32>
    %34 = vector.broadcast %33 : vector<1x512xf32> to vector<4x512xf32>
    %35 = arith.mulf %32, %34 : vector<4x512xf32>
    %c496_i32 = arith.constant 496 : i32
    %36 = tpu.dynamic_rotate %11 by %c496_i32 dim 1 : vector<4x512xf32>, i32 -> vector<4x512xf32>
    %c6 = arith.constant 6 : index
    %c0_17 = arith.constant 0 : index
    %37 = vector.load %arg6[%c6, %c0_17] : memref<8x512xf32, #tpu.memory_space<vmem>>, vector<1x512xf32>
    %38 = vector.broadcast %37 : vector<1x512xf32> to vector<4x512xf32>
    %39 = arith.mulf %36, %38 : vector<4x512xf32>
    %c495_i32 = arith.constant 495 : i32
    %40 = tpu.dynamic_rotate %11 by %c495_i32 dim 1 : vector<4x512xf32>, i32 -> vector<4x512xf32>
    %c7 = arith.constant 7 : index
    %c0_18 = arith.constant 0 : index
    %41 = vector.load %arg6[%c7, %c0_18] : memref<8x512xf32, #tpu.memory_space<vmem>>, vector<1x512xf32>
    %42 = vector.broadcast %41 : vector<1x512xf32> to vector<4x512xf32>
    %43 = arith.mulf %40, %42 : vector<4x512xf32>
    %44 = tpu.concatenate %15, %19, %23, %27, %11, %31, %35, %39, %43 in 0 : vector<4x512xf32>, vector<4x512xf32>, vector<4x512xf32>, vector<4x512xf32>, vector<4x512xf32>, vector<4x512xf32>, vector<4x512xf32>, vector<4x512xf32>, vector<4x512xf32> -> vector<36x512xf32>
    %c0_19 = arith.constant 0 : index
    %c0_20 = arith.constant 0 : index
    %45 = vector.load %arg3[%c0_19, %c0_20] : memref<4x36xf32, #tpu.memory_space<vmem>>, vector<4x36xf32>
    %cst_21 = arith.constant dense<0.000000e+00> : vector<4x512xf32>
    %46 = tpu.matmul %45, %44, %cst_21 {dimension_numbers = #tpu.dot_dimension_numbers<[1], [0], [0], [1], [0, 0, 1, 1], [], []>} : vector<4x36xf32>, vector<36x512xf32>, vector<4x512xf32> -> vector<4x512xf32>
    %c0_22 = arith.constant 0 : index
    %c0_23 = arith.constant 0 : index
    %47 = vector.load %arg4[%c0_22, %c0_23] : memref<4x1xf32, #tpu.memory_space<vmem>>, vector<4x1xf32>
    %48 = vector.broadcast %47 : vector<4x1xf32> to vector<4x512xf32>
    %49 = arith.addf %46, %48 : vector<4x512xf32>
    %cst_24 = arith.constant 0.000000e+00 : f32
    %50 = vector.broadcast %cst_24 : f32 to vector<4x512xf32>
    %51 = arith.maximumf %49, %50 : vector<4x512xf32>
    %52 = tpu.concatenate %51, %4 in 0 : vector<4x512xf32>, vector<4x512xf32> -> vector<8x512xf32>
    %c0_25 = arith.constant 0 : index
    %c0_26 = arith.constant 0 : index
    %53 = vector.load %arg5[%c0_25, %c0_26] : memref<8x8xf32, #tpu.memory_space<vmem>>, vector<8x8xf32>
    %cst_27 = arith.constant dense<0.000000e+00> : vector<8x512xf32>
    %54 = tpu.matmul %53, %52, %cst_27 {dimension_numbers = #tpu.dot_dimension_numbers<[1], [0], [0], [1], [0, 0, 1, 1], [], []>} : vector<8x8xf32>, vector<8x512xf32>, vector<8x512xf32> -> vector<8x512xf32>
    %55 = vector.extract_strided_slice %54 {offsets = [0, 0], sizes = [8, 256], strides = [1, 1]} : vector<8x512xf32> to vector<8x256xf32>
    %c0_28 = arith.constant 0 : index
    %c0_29 = arith.constant 0 : index
    %c0_30 = arith.constant 0 : index
    %56 = vector.load %arg7[%c0_28, %c0_29, %c0_30] : memref<2x8x256xf32, #tpu.memory_space<vmem>>, vector<1x8x256xf32>
    %57 = vector.shape_cast %56 : vector<1x8x256xf32> to vector<8x256xf32>
    %58 = vector.shape_cast %55 : vector<8x256xf32> to vector<1x8x256xf32>
    tpu.vector_store %arg7[%c0_28, %c0_29, %c0_30], %58 {strides = array<i32>} : memref<2x8x256xf32, #tpu.memory_space<vmem>>, vector<1x8x256xf32>,
    %59 = vector.extract_strided_slice %54 {offsets = [0, 256], sizes = [8, 256], strides = [1, 1]} : vector<8x512xf32> to vector<8x256xf32>
    %c1_31 = arith.constant 1 : index
    %c0_32 = arith.constant 0 : index
    %c0_33 = arith.constant 0 : index
    %60 = vector.load %arg7[%c1_31, %c0_32, %c0_33] : memref<2x8x256xf32, #tpu.memory_space<vmem>>, vector<1x8x256xf32>
    %61 = vector.shape_cast %60 : vector<1x8x256xf32> to vector<8x256xf32>
    %62 = vector.shape_cast %59 : vector<8x256xf32> to vector<1x8x256xf32>
    tpu.vector_store %arg7[%c1_31, %c0_32, %c0_33], %62 {strides = array<i32>} : memref<2x8x256xf32, #tpu.memory_space<vmem>>, vector<1x8x256xf32>,
    return
  }
}

</mosaic_0001>

<bundles_post_ra>
// kernel: tpu_custom_call.1
= control target key start
LH: loop header
LB: loop body
LE: loop exit
PB: predicated region body
PF: predicated region fallthrough
CT: control target
= control target key end

     0   :  { %12 = vsyncpa [#allocation3], 0  ;;  %s1632_s0 = inlined_call_operand.hbm [shape: f32[2,4,256], index: 0, kind: input, shape index: {}]   ;;  %s1633_s1 = inlined_call_operand.hbm [shape: f32[4,4], index: 1, kind: input, shape index: {}]   ;;  %s1634_s2 = inlined_call_operand.vmem [shape: f32[4,1], index: 2, kind: input, shape index: {}]   ;;  %s1635_s3 = inlined_call_operand.hbm [shape: f32[4,36], index: 3, kind: input, shape index: {}]   ;;  %s1636_s4 = inlined_call_operand.vmem [shape: f32[4,1], index: 4, kind: input, shape index: {}]   ;;  %s1637_s5 = inlined_call_operand.hbm [shape: f32[8,8], index: 5, kind: input, shape index: {}]   ;;  %s1638_s6 = inlined_call_operand.vmem [shape: f32[8,512], index: 6, kind: input, shape index: {}]   ;;  %s1639_s7 = inlined_call_operand.hbm [shape: f32[2,8,256], index: 7, kind: output, shape index: {}]  }
   0x1   :  { %13 = vsyncpa [#allocation6], 0 }
   0x2   :  { %14 = vsyncpa [#allocation9], 0 }
   0x3   :  { %15 = vsyncpa [#allocation4], 0  ;;  %s1163_s24 = smov [#allocation5]   ;;  %s1164_s26 = smov [#allocation2]  }
   0x4   :  { %s34_s25 = sshll.u32 %s1163_s24, 4  ;;  %s21_s27 = sshll.u32 %s1164_s26, 4  ;;  %s35_s25 = int_to_ptr.vmem [resolvable:$true] %s34_s25  ;;  %s1221_s27 = int_to_ptr.vmem [resolvable:$true] %s21_s27 }
   0x5   :  { %s1045_s30 = scalar_lea.hbm %s1633_s1, 64 }
   0x6   :  { %p1046_p0 = scmp.ne.s32.totalorder %s1633_s1, %s1045_s30  ;;  %p1049_p1 = scmp.lt.u32.totalorder %s1045_s30, %s1633_s1 }
   0x8   :  { %p1051_p2 = pnand %p1049_p1, %p1046_p0 }
   0xa   :  { %1054 = shalt.err (!%p1051_p2)
}
   0xb   :  { %s1055_s12 = scalar_lea.vmem %s35_s25, 64  ;;  %p1060_p4 = scmp.lt.s32.totalorder %s35_s25, %s35_s25 }
   0xc   :  { %p1056_p3 = scmp.ne.s32.totalorder %s35_s25, %s1055_s12  ;;  %p1061_p5 = scmp.lt.s32.totalorder %s1055_s12, %s1055_s12 }
   0xe   :  { %p1062_p6 = por %p1061_p5, %p1060_p4 }
  0x10   :  { %p1063_p7 = pnand %p1062_p6, %p1056_p3 }
  0x12   :  { %1066 = shalt.err (!%p1063_p7)
}
  0x13   :  { %37 = dma.hbm_to_vmem [thread:$0]  %s1633_s1, 64, %s35_s25, [#allocation6]  }
  0x14   :  { %s1067_s17 = scalar_lea.hbm %s1632_s0, 256 }
  0x15   :  { %p1068_p8 = scmp.ne.s32.totalorder %s1632_s0, %s1067_s17  ;;  %p1071_p9 = scmp.lt.u32.totalorder %s1067_s17, %s1632_s0 }
  0x17   :  { %p1073_p10 = pnand %p1071_p9, %p1068_p8 }
  0x19   :  { %1076 = shalt.err (!%p1073_p10)
}
  0x1a   :  { %s1077_s22 = scalar_lea.vmem %s1221_s27, 256  ;;  %p1082_p12 = scmp.lt.s32.totalorder %s1221_s27, %s1221_s27 }
  0x1b   :  { %p1078_p11 = scmp.ne.s32.totalorder %s1221_s27, %s1077_s22  ;;  %p1083_p13 = scmp.lt.s32.totalorder %s1077_s22, %s1077_s22 }
  0x1d   :  { %p1084_p0 = por %p1083_p13, %p1082_p12 }
  0x1f   :  { %p1085_p1 = pnand %p1084_p0, %p1078_p11 }
  0x21   :  { %1088 = shalt.err (!%p1085_p1)
}
  0x22   :  { %s1165_s1 = smov 128   ;;  %s1166_s23 = smov 8  }
  0x23   :  { %27 = dma.hbm_to_vmem [thread:$0]  %s1632_s0, 256, %s1221_s27, [#allocation3], %s1165_s1, %s1165_s1, %s1166_s23  }
  0x24   :  { %s1167_s26 = smov [#allocation7]   ;;  %s1168_s29 = smov [#allocation8]  }
  0x25   :  { %s46_s28 = sshll.u32 %s1167_s26, 4  ;;  %s58_s30 = sshll.u32 %s1168_s29, 4  ;;  %s47_s28 = int_to_ptr.vmem [resolvable:$true] %s46_s28  ;;  %s59_s30 = int_to_ptr.vmem [resolvable:$true] %s58_s30 }
  0x26   :  { %s1089_s10 = scalar_lea.hbm %s1635_s3, 64 }
  0x27   :  { %p1090_p2 = scmp.ne.s32.totalorder %s1635_s3, %s1089_s10  ;;  %p1093_p3 = scmp.lt.u32.totalorder %s1089_s10, %s1635_s3 }
  0x29   :  { %p1095_p4 = pnand %p1093_p3, %p1090_p2 }
  0x2b   :  { %1098 = shalt.err (!%p1095_p4)
}
  0x2c   :  { %s1099_s0 = scalar_lea.vmem %s47_s28, 64  ;;  %p1104_p6 = scmp.lt.s32.totalorder %s47_s28, %s47_s28 }
  0x2d   :  { %p1100_p5 = scmp.ne.s32.totalorder %s47_s28, %s1099_s0  ;;  %p1105_p7 = scmp.lt.s32.totalorder %s1099_s0, %s1099_s0 }
  0x2f   :  { %p1106_p8 = por %p1105_p7, %p1104_p6 }
  0x31   :  { %p1107_p9 = pnand %p1106_p8, %p1100_p5 }
  0x33   :  { %1110 = shalt.err (!%p1107_p9)
}
  0x34   :  { %49 = dma.hbm_to_vmem [thread:$0]  %s1635_s3, 64, %s47_s28, [#allocation6]  }
  0x35   :  { %s1111_s18 = scalar_lea.hbm %s1637_s5, 128 }
  0x36   :  { %p1112_p10 = scmp.ne.s32.totalorder %s1637_s5, %s1111_s18  ;;  %p1115_p11 = scmp.lt.u32.totalorder %s1111_s18, %s1637_s5 }
  0x38   :  { %p1117_p12 = pnand %p1115_p11, %p1112_p10 }
  0x3a   :  { %1120 = shalt.err (!%p1117_p12)
}
  0x3b   :  { %s1121_s1 = scalar_lea.vmem %s59_s30, 128  ;;  %p1126_p0 = scmp.lt.s32.totalorder %s59_s30, %s59_s30 }
  0x3c   :  { %p1122_p13 = scmp.ne.s32.totalorder %s59_s30, %s1121_s1  ;;  %p1127_p1 = scmp.lt.s32.totalorder %s1121_s1, %s1121_s1 }
  0x3e   :  { %p1128_p2 = por %p1127_p1, %p1126_p0 }
  0x40   :  { %p1129_p3 = pnand %p1128_p2, %p1122_p13 }
  0x42   :  { %1132 = shalt.err (!%p1129_p3)
}
  0x43   :  { %61 = dma.hbm_to_vmem [thread:$0]  %s1637_s5, 128, %s59_s30, [#allocation9]  }
  0x44   :  { %1155 = dma.done.wait [#allocation3], 256  }
  0x45   :  { %1156 = vsyncadd [#allocation3], 4294967040 }
  0x46   :  { %1157 = dma.done.wait [#allocation6], 128  }
  0x47   :  { %1158 = vsyncadd [#allocation6], 4294967168 }
  0x48   :  { %1159 = dma.done.wait [#allocation9], 128  }
  0x49   :  { %1160 = vsyncadd [#allocation9], 4294967168  ;;  %v1169_v0 = vmov 0.0   ;;  %v1170_v1 = vmov 0   ;;  %v1278_v2 = vld [vmem:[#allocation2] sm:$0xff]  ;;  %vm94_vm0 = vcmask 1043456   ;;  %v257_v28 = vlaneseq }
  0x4a   :  { %167 = vmatprep.mubr.f32.mxu0 %v1169_v0  ;;  %238 = vmatprep.mubr.f32.mxu1 %v1169_v0  ;;  %v1280_v3 = vld [vmem:[#allocation2 + $0x8] sm:$0xff]  ;;  %v1284_v4 = vcombine.high %v1278_v2, %v1278_v2  ;;  %v84_v6 = vld [vmem:[%s1634_s2] sm:$0xf]  ;;  %v83_v7 = vld [vmem:[#allocation5] sm:$0xf]  ;;  %vm90_vm1 = vcmask 31744  }
  0x4b   :  { %1041 = vset.pattern.permute.xlu0 %v1170_v1  ;;  %1042 = vset.pattern.permute.xlu1 %v1170_v1  ;;  %v1288_v5 = vcombine.high %v1280_v3, %v1280_v3  ;;  %s1171_s2 = smov 16   ;;  %s1172_s25 = smov 1   ;;  %v635_v21 = vld [vmem:[%s1636_s4] sm:$0xf]  ;;  %v267_v31 = vshrl.u32 %v257_v28, 7  ;;  %v1366_v32 = vand.u32 127, %v257_v28 }
  0x4c   :  { %87 = vperm.xlu0 %1041, %v84_v6   ;;  %986 = vmatprep.subr.msk.mxu0 %vm94_vm0, %v1284_v4  ;;  %s1173_s26 = smov 17   ;;  %s1174_s28 = smov 15   ;;  %v1377_v36 = vld [vmem:[%s1638_s6 + $0x1] ss:$8 sm:$0xf]  ;;  %vm641_vm10 = vcmask 293888  }
  0x4d   :  { %989 = vmatprep.subr.msk.mxu1 %vm94_vm0, %v1288_v5  ;;  %987 = vmatpush1.msk.msra.mxu0 %vm94_vm0, %v1278_v2  ;;  %s1175_s29 = smov 127   ;;  %s1176_s30 = smov 112   ;;  %v1372_v35 = vsub.s32 3, %v267_v31  ;;  %vm298_vm2 = vcmp.lt.s32.totalorder %v1366_v32, 16  ;;  %vm378_vm3 = vcmp.lt.s32.totalorder %v1366_v32, 1  ;;  %v1405_v45 = vsub.s32 0, %v267_v31 }
  0x4e   :  { %990 = vmatpush1.msk.msra.mxu1 %vm94_vm0, %v1280_v3  ;;  %988 = vmatmul.mubr.msk.f32.vlgmr.msra.gmra.mrb[0].mxu0 %vm90_vm1, %v83_v7  ;;  %s1177_s8 = smov 113   ;;  %s1178_s9 = smov 111   ;;  %v1385_v39 = vld [vmem:[%s1638_s6 + $0x3] ss:$8 sm:$0xf]  ;;  %vm259_vm4 = vcmp.lt.s32.totalorder %v1366_v32, 17 }
  0x4f   :  { %991 = vmatmul.mubr.msk.f32.vlgmr.msra.gmra.mrb[0].mxu1 %vm90_vm1, %v83_v7  ;;  %721 = vmatprep.mubr.f32.mxu0 %v1169_v0  ;;  %v321_v40 = vrot.slane %v1377_v36, %v1372_v35  ;;  %v401_v41 = vrot.slane %v1385_v39, %v1372_v35  ;;  %v1403_v44 = vld [vmem:[%s1638_s6] ss:$8 sm:$0xf]  ;;  %v1412_v49 = vsub.s32 1, %v267_v31  ;;  %v1414_v50 = vsub.s32 2, %v267_v31 }
  0x50   :  { %792 = vmatprep.mubr.f32.mxu1 %v1169_v0  ;;  %v281_v46 = vrot.slane %v1403_v44, %v1372_v35  ;;  %v1422_v52 = vld [vmem:[%s1638_s6 + $0x2] ss:$8 sm:$0xf]  ;;  %v309_v56 = vrot.slane %v1377_v36, %v1405_v45  ;;  %vm338_vm5 = vcmp.lt.s32.totalorder %v1366_v32, 15  ;;  %v389_v62 = vrot.slane %v1385_v39, %v1405_v45 }
  0x51   :  { %v361_v55 = vrot.slane %v1422_v52, %v1372_v35  ;;  %v393_v60 = vrot.slane %v1385_v39, %v1412_v49  ;;  %v397_v61 = vrot.slane %v1385_v39, %v1414_v50  ;;  %v273_v7 = vrot.slane %v1403_v44, %v1412_v49  ;;  %v1462_v31 = vld [vmem:[%s1638_s6 + $0x6] ss:$8 sm:$0xf] }
  0x52   :  { %vm418_vm6 = vcmp.lt.s32.totalorder %v1366_v32, 127  ;;  %vm498_vm7 = vcmp.lt.s32.totalorder %v1366_v32, 112  ;;  %vm458_vm8 = vcmp.lt.s32.totalorder %v1366_v32, 113  ;;  %vm538_vm9 = vcmp.lt.s32.totalorder %v1366_v32, 111 }
  0x53   :  { %vm816_vm11 = vcmask 64512  }
  0xcb   :  { %v88_v8 = vpop.permute.xlu0 %87 }
 0x121   :  { %v169_v9 = vpop.f32.mrb[0].mxu0 }
 0x122   :  { %v240_v10 = vpop.f32.mrb[0].mxu1  ;;  %v170_v11 = vadd.f32 %v169_v9, %v88_v8  ;;  %v171_v13 = vpop.f32.mrb[1].mxu0  ;;  %v1444_v9 = vld [vmem:[%s1638_s6 + $0x4] ss:$8 sm:$0xf] }
 0x123   :  { %v241_v12 = vadd.f32 %v240_v10, %v88_v8  ;;  %v242_v14 = vpop.f32.mrb[1].mxu1  ;;  %v172_v18 = vadd.f32 %v171_v13, %v88_v8  ;;  %v277_v10 = vrot.slane %v1403_v44, %v1414_v50  ;;  %v357_v13 = vrot.slane %v1422_v52, %v1414_v50 }
 0x124   :  { %v1303_v15 = vmax.f32 %v170_v11, 0.0  ;;  %v243_v17 = vadd.f32 %v242_v14, %v88_v8  ;;  %v269_v11 = vrot.slane %v1403_v44, %v1405_v45  ;;  %v349_v14 = vrot.slane %v1422_v52, %v1405_v45 }
 0x125   :  { %v1305_v16 = vmax.f32 %v241_v12, 0.0  ;;  %v1316_v20 = vmax.f32 %v172_v18, 0.0  ;;  %v353_v12 = vrot.slane %v1422_v52, %v1412_v49  ;;  %v429_v39 = vrot.slane %v1444_v9, %v1405_v45 }
 0x126   :  { %290 = vrot.lane.b32.xlu0 %v1303_v15, %s1171_s2  ;;  %v1311_v19 = vmax.f32 %v243_v17, 0.0  ;;  %v509_v52 = vrot.slane %v1462_v31, %v1405_v45 }
 0x127   :  { %294 = vrot.lane.b32.xlu1 %v1305_v16, %s1171_s2 }
 0x12a   :  { %296 = vrot.lane.b32.xlu0 %v1311_v19, %s1171_s2 }
 0x12b   :  { %370 = vrot.lane.b32.xlu1 %v1303_v15, %s1172_s25 }
 0x12e   :  { %372 = vrot.lane.b32.xlu0 %v1316_v20, %s1172_s25 }
 0x12f   :  { %374 = vrot.lane.b32.xlu1 %v1305_v16, %s1172_s25 }
 0x132   :  { %376 = vrot.lane.b32.xlu0 %v1311_v19, %s1172_s25 }
 0x133   :  { %249 = vrot.lane.b32.xlu1 %v1303_v15, %s1173_s26 }
 0x136   :  { %251 = vrot.lane.b32.xlu0 %v1316_v20, %s1173_s26 }
 0x137   :  { %253 = vrot.lane.b32.xlu1 %v1305_v16, %s1173_s26 }
 0x13a   :  { %255 = vrot.lane.b32.xlu0 %v1311_v19, %s1173_s26 }
 0x13b   :  { %330 = vrot.lane.b32.xlu1 %v1303_v15, %s1174_s28 }
 0x13e   :  { %332 = vrot.lane.b32.xlu0 %v1316_v20, %s1174_s28 }
 0x13f   :  { %334 = vrot.lane.b32.xlu1 %v1305_v16, %s1174_s28 }
 0x142   :  { %336 = vrot.lane.b32.xlu0 %v1311_v19, %s1174_s28 }
 0x143   :  { %410 = vrot.lane.b32.xlu1 %v1303_v15, %s1175_s29 }
 0x146   :  { %412 = vrot.lane.b32.xlu0 %v1316_v20, %s1175_s29 }
 0x147   :  { %414 = vrot.lane.b32.xlu1 %v1305_v16, %s1175_s29 }
 0x14a   :  { %416 = vrot.lane.b32.xlu0 %v1311_v19, %s1175_s29 }
 0x14b   :  { %490 = vrot.lane.b32.xlu1 %v1303_v15, %s1176_s30 }
 0x14e   :  { %492 = vrot.lane.b32.xlu0 %v1316_v20, %s1176_s30 }
 0x14f   :  { %494 = vrot.lane.b32.xlu1 %v1305_v16, %s1176_s30 }
 0x152   :  { %496 = vrot.lane.b32.xlu0 %v1311_v19, %s1176_s30 }
 0x153   :  { %292 = vrot.lane.b32.xlu1 %v1316_v20, %s1171_s2 }
 0x156   :  { %452 = vrot.lane.b32.xlu0 %v1316_v20, %s1177_s8 }
 0x157   :  { %450 = vrot.lane.b32.xlu1 %v1303_v15, %s1177_s8 }
 0x15a   :  { %456 = vrot.lane.b32.xlu0 %v1311_v19, %s1177_s8 }
 0x15b   :  { %454 = vrot.lane.b32.xlu1 %v1305_v16, %s1177_s8 }
 0x15e   :  { %532 = vrot.lane.b32.xlu0 %v1316_v20, %s1178_s9 }
 0x15f   :  { %530 = vrot.lane.b32.xlu1 %v1303_v15, %s1178_s9 }
 0x162   :  { %536 = vrot.lane.b32.xlu0 %v1311_v19, %s1178_s9 }
 0x163   :  { %534 = vrot.lane.b32.xlu1 %v1305_v16, %s1178_s9 }
 0x167   :  { %638 = vperm.xlu1 %1042, %v635_v21  }
 0x198   :  { %v1352_v23 = vpop.permute.xlu0 %290 }
 0x199   :  { %v1350_v22 = vpop.permute.xlu1 %294 }
 0x19c   :  { %v1356_v25 = vpop.permute.xlu0 %296 }
 0x19d   :  { %v1354_v24 = vpop.permute.xlu1 %370  ;;  %v299_v42 = vsel %vm298_vm2, %v1350_v22, %v1356_v25 }
 0x19e   :  { %v329_v53 = vmul.f32 %v321_v40, %v299_v42  ;;  %v433_v40 = vrot.slane %v1444_v9, %v1412_v49  ;;  %v437_v42 = vrot.slane %v1444_v9, %v1414_v50 }
 0x1a0   :  { %v1360_v27 = vpop.permute.xlu0 %372  ;;  %v577_v1 = vrot.slane %v329_v53, 4 }
 0x1a1   :  { %v1358_v26 = vpop.permute.xlu1 %374 }
 0x1a2   :  { %v380_v44 = vsel %vm378_vm3, %v1360_v27, %v1358_v26 }
 0x1a4   :  { %v1364_v30 = vpop.permute.xlu0 %376 }
 0x1a5   :  { %v1362_v29 = vpop.permute.xlu1 %249  ;;  %v379_v43 = vsel %vm378_vm3, %v1358_v26, %v1364_v30  ;;  %v513_v26 = vrot.slane %v1462_v31, %v1412_v49 }
 0x1a6   :  { %v409_v54 = vmul.f32 %v401_v41, %v379_v43  ;;  %v302_v43 = vsel %vm298_vm2, %v1356_v25, %v1352_v23  ;;  %v382_v25 = vsel %vm378_vm3, %v1364_v30, %v1354_v24  ;;  %v317_v30 = vrot.slane %v1377_v36, %v1414_v50 }
 0x1a8   :  { %v1370_v34 = vpop.permute.xlu0 %251  ;;  %v589_v6 = vrot.slane %v409_v54, 4 }
 0x1a9   :  { %v1368_v33 = vpop.permute.xlu1 %253 }
 0x1ac   :  { %v256_v38 = vpop.permute.xlu0 %255 }
 0x1ad   :  { %v1380_v37 = vpop.permute.xlu1 %330  ;;  %v260_v51 = vsel %vm259_vm4, %v1368_v33, %v256_v38  ;;  %v263_v53 = vsel %vm259_vm4, %v256_v38, %v1362_v29  ;;  %v517_v38 = vrot.slane %v1462_v31, %v1414_v50 }
 0x1ae   :  { %v289_v57 = vmul.f32 %v281_v46, %v260_v51  ;;  %v441_v46 = vrot.slane %v1444_v9, %v1372_v35  ;;  %v381_v51 = vsel %vm378_vm3, %v1354_v24, %v1360_v27  ;;  %v313_v24 = vrot.slane %v1377_v36, %v1412_v49 }
 0x1af   :  { %v261_v36 = vsel %vm259_vm4, %v1370_v34, %v1368_v33 }
 0x1b0   :  { %v1410_v48 = vpop.permute.xlu0 %332  ;;  %v621_v21 = vsel %vm94_vm0, %v289_v57, %v577_v1  ;;  %v326_v57 = vmul.f32 %v309_v56, %v302_v43  ;;  %v262_v56 = vsel %vm259_vm4, %v1362_v29, %v1370_v34 }
 0x1b1   :  { %v335_v47 = vpop.permute.xlu1 %334 }
 0x1b2   :  { %v340_v27 = vsel %vm338_vm5, %v1410_v48, %v335_v47  ;;  %v574_v43 = vrot.slane %v326_v57, 4 }
 0x1b4   :  { %v337_v59 = vpop.permute.xlu0 %336 }
 0x1b5   :  { %v1429_v58 = vpop.permute.xlu1 %410  ;;  %v339_v63 = vsel %vm338_vm5, %v335_v47, %v337_v59  ;;  %v342_v1 = vsel %vm338_vm5, %v337_v59, %v1380_v37  ;;  %v1511_v47 = vld [vmem:[%s1638_s6 + $0x5] ss:$8 sm:$0xf]  ;;  %v286_v59 = vmul.f32 %v269_v11, %v263_v53 }
 0x1b6   :  { %v369_v8 = vmul.f32 %v361_v55, %v339_v63  ;;  %v408_v63 = vmul.f32 %v397_v61, %v380_v44  ;;  %v368_v61 = vmul.f32 %v357_v13, %v340_v27  ;;  %v473_v33 = vrot.slane %v1511_v47, %v1412_v49 }
 0x1b7   :  { %v477_v29 = vrot.slane %v1511_v47, %v1414_v50  ;;  %v481_v34 = vrot.slane %v1511_v47, %v1372_v35 }
 0x1b8   :  { %v413_v18 = vpop.permute.xlu0 %412  ;;  %v625_v28 = vsel %vm94_vm0, %v369_v8, %v589_v6  ;;  %v407_v6 = vmul.f32 %v393_v60, %v381_v51  ;;  %v406_v8 = vmul.f32 %v389_v62, %v382_v25  ;;  %v341_v60 = vsel %vm338_vm5, %v1380_v37, %v1410_v48 }
 0x1b9   :  { %v415_v17 = vpop.permute.xlu1 %414  ;;  %v1015_v41 = vpack.c.bf16 %v625_v28, %v621_v21  ;;  %v521_v21 = vrot.slane %v1462_v31, %v1372_v35  ;;  %v366_v62 = vmul.f32 %v349_v14, %v342_v1  ;;  %v588_v44 = vrot.slane %v408_v63, 4 }
 0x1ba   :  { %v587_v11 = vrot.slane %v407_v6, 4  ;;  %v586_v13 = vrot.slane %v406_v8, 4  ;;  %v287_v37 = vmul.f32 %v273_v7, %v262_v56  ;;  %v288_v48 = vmul.f32 %v277_v10, %v261_v36 }
 0x1bb   :  { %1016 = vmatprep.subr.bf16.mxu1 %v1015_v41  ;;  %v469_v41 = vrot.slane %v1511_v47, %v1405_v45  ;;  %v618_v14 = vsel %vm94_vm0, %v286_v59, %v574_v43  ;;  %v367_v51 = vmul.f32 %v353_v12, %v341_v60  ;;  %v624_v25 = vsel %vm94_vm0, %v368_v61, %v588_v44 }
 0x1bc   :  { %v417_v55 = vpop.permute.xlu0 %416  ;;  %v420_v53 = vsel %vm418_vm6, %v413_v18, %v415_v17  ;;  %v622_v27 = vsel %vm94_vm0, %v366_v62, %v586_v13  ;;  %v421_v57 = vsel %vm418_vm6, %v1429_v58, %v413_v18 }
 0x1bd   :  { %v491_v54 = vpop.permute.xlu1 %490  ;;  %v419_v63 = vsel %vm418_vm6, %v415_v17, %v417_v55  ;;  %v422_v7 = vsel %vm418_vm6, %v417_v55, %v1429_v58  ;;  %v447_v18 = vmul.f32 %v433_v40, %v420_v53  ;;  %v446_v55 = vmul.f32 %v429_v39, %v421_v57 }
 0x1be   :  { %v448_v56 = vmul.f32 %v437_v42, %v419_v63  ;;  %v449_v59 = vmul.f32 %v441_v46, %v422_v7  ;;  %v1009_v43 = vpack.c.bf16 %v622_v27, %v618_v14 }
 0x1bf   :  { %v599_v9 = vrot.slane %v447_v18, 4  ;;  %v598_v13 = vrot.slane %v446_v55, 4 }
 0x1c0   :  { %v493_v31 = vpop.permute.xlu0 %492  ;;  %v601_v53 = vrot.slane %v449_v59, 4 }
 0x1c1   :  { %v495_v28 = vpop.permute.xlu1 %494  ;;  %v501_v47 = vsel %vm498_vm7, %v491_v54, %v493_v31 }
 0x1c2   :  { %v500_v1 = vsel %vm498_vm7, %v493_v31, %v495_v28 }
 0x1c3   :  { %v527_v60 = vmul.f32 %v513_v26, %v500_v1 }
 0x1c4   :  { %v497_v12 = vpop.permute.xlu0 %496 }
 0x1c5   :  { %v293_v10 = vpop.permute.xlu1 %292  ;;  %v499_v58 = vsel %vm498_vm7, %v495_v28, %v497_v12  ;;  %v502_v61 = vsel %vm498_vm7, %v497_v12, %v491_v54  ;;  %v623_v28 = vsel %vm94_vm0, %v367_v51, %v587_v11  ;;  %v600_v54 = vrot.slane %v448_v56, 4 }
 0x1c6   :  { %v300_v6 = vsel %vm298_vm2, %v293_v10, %v1350_v22  ;;  %v301_v17 = vsel %vm298_vm2, %v1352_v23, %v293_v10  ;;  %v526_v22 = vmul.f32 %v509_v52, %v501_v47  ;;  %v529_v42 = vmul.f32 %v521_v21, %v502_v61 }
 0x1c7   :  { %v327_v8 = vmul.f32 %v313_v24, %v301_v17  ;;  %v328_v36 = vmul.f32 %v317_v30, %v300_v6  ;;  %v528_v24 = vmul.f32 %v517_v38, %v499_v58  ;;  %v611_v38 = vrot.slane %v527_v60, 4 }
 0x1c8   :  { %v453_v40 = vpop.permute.xlu0 %452  ;;  %v610_v57 = vrot.slane %v526_v22, 4  ;;  %v627_v12 = vsel %vm94_vm0, %v1316_v20, %v599_v9  ;;  %v626_v17 = vsel %vm94_vm0, %v1303_v15, %v598_v13 }
 0x1c9   :  { %v575_v62 = vrot.slane %v327_v8, 4  ;;  %v576_v31 = vrot.slane %v328_v36, 4  ;;  %v451_v23 = vpop.permute.xlu1 %450  ;;  %v612_v10 = vrot.slane %v528_v24, 4  ;;  %v803_v24 = vrot.slane %v1278_v2, 4 }
 0x1ca   :  { %v461_v30 = vsel %vm458_vm8, %v451_v23, %v453_v40 }
 0x1cb   :  { %v620_v39 = vsel %vm94_vm0, %v288_v48, %v576_v31  ;;  %v619_v46 = vsel %vm94_vm0, %v287_v37, %v575_v62  ;;  %v486_v52 = vmul.f32 %v469_v41, %v461_v30  ;;  %v613_v41 = vrot.slane %v529_v42, 4  ;;  %v634_v31 = vld [vmem:[#allocation7] sm:$0xf] }
 0x1cc   :  { %v1007_v26 = vpack.c.bf16 %v623_v28, %v619_v46  ;;  %v1017_v44 = vpack.c.bf16 %v624_v25, %v620_v39  ;;  %v457_v7 = vpop.permute.xlu0 %456  ;;  %v628_v25 = vsel %vm94_vm0, %v1305_v16, %v600_v54  ;;  %v629_v16 = vsel %vm94_vm0, %v1311_v19, %v601_v53 }
 0x1cd   :  { %v455_v63 = vpop.permute.xlu1 %454  ;;  %v462_v21 = vsel %vm458_vm8, %v457_v7, %v451_v23  ;;  %v630_v27 = vsel %vm94_vm0, %v486_v52, %v610_v57  ;;  %v805_v30 = vrot.slane %v1280_v3, 4  ;;  %v815_v3 = vld [vmem:[#allocation8] sm:$0xff] }
 0x1ce   :  { %v460_v11 = vsel %vm458_vm8, %v453_v40, %v455_v63  ;;  %v459_v48 = vsel %vm458_vm8, %v455_v63, %v457_v7  ;;  %1008 = vmatprep.subr.bf16.mxu0 %v1007_v26  ;;  %1018 = vmatpush1.bf16.msra.mxu1 %v1017_v44  ;;  %v489_v51 = vmul.f32 %v481_v34, %v462_v21 }
 0x1cf   :  { %v487_v37 = vmul.f32 %v473_v33, %v460_v11  ;;  %v488_v14 = vmul.f32 %v477_v29, %v459_v48  ;;  %1010 = vmatpush1.bf16.msra.mxu0 %v1009_v43  ;;  %v998_v33 = vld [vmem:[%s1638_s6 + $0x7] ss:$8 sm:$0xf]  ;;  %v1013_v58 = vpack.c.bf16 %v630_v27, %v626_v17  ;;  %s1179_s6 = smov [#allocation10]  }
 0x1d0   :  { %v533_v29 = vpop.permute.xlu0 %532  ;;  %v633_v6 = vsel %vm94_vm0, %v489_v51, %v613_v41  ;;  %v553_v36 = vrot.slane %v998_v33, %v1412_v49  ;;  %v557_v55 = vrot.slane %v998_v33, %v1414_v50  ;;  %v561_v56 = vrot.slane %v998_v33, %v1372_v35  ;;  %s972_s23 = sshll.u32 %s1179_s6, 4  ;;  %s973_s23 = int_to_ptr.vmem [resolvable:$true] %s972_s23 }
 0x1d1   :  { %v632_v1 = vsel %vm94_vm0, %v488_v14, %v612_v10  ;;  %v531_v47 = vpop.permute.xlu1 %530  ;;  %v631_v34 = vsel %vm94_vm0, %v487_v37, %v611_v38  ;;  %v1019_v20 = vpack.c.bf16 %v633_v6, %v629_v16  ;;  %v549_v59 = vrot.slane %v998_v33, %v1405_v45  ;;  %s1133_s5 = scalar_lea.vmem %s973_s23, 512  ;;  %p1138_p5 = scmp.lt.s32.totalorder %s973_s23, %s973_s23 }
 0x1d2   :  { %v1011_v18 = vpack.c.bf16 %v631_v34, %v627_v12  ;;  %v1021_v8 = vpack.c.bf16 %v632_v1, %v628_v25  ;;  %v541_v19 = vsel %vm538_vm9, %v531_v47, %v533_v29  ;;  %p1134_p4 = scmp.ne.s32.totalorder %s973_s23, %s1133_s5  ;;  %p1139_p6 = scmp.lt.s32.totalorder %s1133_s5, %s1133_s5 }
 0x1d3   :  { %1020 = vmatprep.subr.bf16.mxu1 %v1019_v20  ;;  %v566_v62 = vmul.f32 %v549_v59, %v541_v19 }
 0x1d4   :  { %1012 = vmatprep.subr.bf16.mxu0 %v1011_v18  ;;  %1022 = vmatpush1.bf16.msra.mxu1 %v1021_v8  ;;  %v537_v15 = vpop.permute.xlu0 %536  ;;  %p1140_p7 = por %p1139_p6, %p1138_p5 }
 0x1d5   :  { %v535_v61 = vpop.permute.xlu1 %534  ;;  %1014 = vmatpush1.bf16.msra.mxu0 %v1013_v58  ;;  %v542_v35 = vsel %vm538_vm9, %v537_v15, %v531_v47 }
 0x1d6   :  { %v540_v22 = vsel %vm538_vm9, %v533_v29, %v535_v61  ;;  %v539_v49 = vsel %vm538_vm9, %v535_v61, %v537_v15  ;;  %v569_v60 = vmul.f32 %v561_v56, %v542_v35  ;;  %p1141_p8 = pnand %p1140_p7, %p1134_p4 }
 0x1d7   :  { %v567_v50 = vmul.f32 %v553_v36, %v540_v22  ;;  %v568_v45 = vmul.f32 %v557_v55, %v539_v49 }
 0x1d8   :  { %1002 = vmatprep.subr.msk.mxu1 %vm94_vm0, %v569_v60 }
 0x1d9   :  { %999 = vmatprep.subr.msk.mxu0 %vm94_vm0, %v567_v50  ;;  %1003 = vmatpush1.msk.msra.mxu1 %vm94_vm0, %v568_v45 }
 0x1da   :  { %1000 = vmatpush1.msk.msra.mxu0 %vm94_vm0, %v566_v62  ;;  %1004 = vmatmul.mubr.msk.f32.vlgmr.msra.gmra.mrb[2].mxu1 %vm641_vm10, %v634_v31 }
 0x1db   :  { %1001 = vmatmul.mubr.msk.f32.vlgmr.msra.gmra.mrb[2].mxu0 %vm641_vm10, %v634_v31  ;;  %955 = vmatprep.mubr.f32.mxu1 %v1169_v0 }
 0x1dc   :  { %884 = vmatprep.mubr.f32.mxu0 %v1169_v0 }
 0x1e6   :  { %v639_v32 = vpop.permute.xlu1 %638 }
 0x2ad   :  { %v794_v40 = vpop.f32.mrb[2].mxu1 }
 0x2ae   :  { %v723_v23 = vpop.f32.mrb[2].mxu0  ;;  %v795_v43 = vadd.f32 %v794_v40, %v639_v32  ;;  %v796_v39 = vpop.f32.mrb[3].mxu1 }
 0x2af   :  { %v724_v28 = vadd.f32 %v723_v23, %v639_v32  ;;  %v725_v9 = vpop.f32.mrb[3].mxu0  ;;  %v797_v46 = vadd.f32 %v796_v39, %v639_v32 }
 0x2b0   :  { %v726_v42 = vadd.f32 %v725_v9, %v639_v32  ;;  %v801_v52 = vmax.f32 %v795_v43, 0.0 }
 0x2b1   :  { %v799_v54 = vmax.f32 %v724_v28, 0.0  ;;  %v802_v44 = vmax.f32 %v797_v46, 0.0 }
 0x2b2   :  { %v800_v26 = vmax.f32 %v726_v42, 0.0  ;;  %v813_v0 = vsel %vm94_vm0, %v801_v52, %v805_v30 }
 0x2b3   :  { %v811_v13 = vsel %vm94_vm0, %v799_v54, %v803_v24  ;;  %v814_v2 = vsel %vm94_vm0, %v802_v44, %v1288_v5 }
 0x2b4   :  { %v812_v53 = vsel %vm94_vm0, %v800_v26, %v1284_v4  ;;  %891 = vmatprep.subr.mxu1 %v814_v2 }
 0x2b5   :  { %820 = vmatprep.subr.mxu0 %v812_v53  ;;  %892 = vmatpush1.msra.mxu1 %v813_v0 }
 0x2b6   :  { %821 = vmatpush1.msra.mxu0 %v811_v13  ;;  %1006 = vmatmul.mubr.msk.f32.vlgmr.msra.gmra.mrb[4].mxu1 %vm816_vm11, %v815_v3 }
 0x2b7   :  { %1005 = vmatmul.mubr.msk.f32.vlgmr.msra.gmra.mrb[4].mxu0 %vm816_vm11, %v815_v3 }
 0x389   :  { %v957_v38 = vpop.f32.mrb[4].mxu1 }
 0x38a   :  { %v886_v57 = vpop.f32.mrb[4].mxu0  ;;  %965 = vst [vmem:[#allocation10 + $0x10] sm:$0xff] %v957_v38  ;;  %v959_v4 = vpop.f32.mrb[5].mxu1 }
 0x38b   :  { %962 = vst [vmem:[#allocation10] sm:$0xff] %v886_v57  ;;  %v888_v63 = vpop.f32.mrb[5].mxu0  ;;  %966 = vst [vmem:[#allocation10 + $0x18] sm:$0xff] %v959_v4 }
 0x38c   :  { %963 = vst [vmem:[#allocation10 + $0x8] sm:$0xff] %v888_v63 }
 0x38d   :  { %1144 = shalt.err (!%p1141_p8)
}
 0x38e   :  { %s1145_s26 = scalar_lea.hbm %s1639_s7, 512 }
 0x38f   :  { %p1146_p9 = scmp.ne.s32.totalorder %s1639_s7, %s1145_s26  ;;  %p1149_p10 = scmp.lt.u32.totalorder %s1145_s26, %s1639_s7 }
 0x391   :  { %p1151_p11 = pnand %p1149_p10, %p1146_p9 }
 0x393   :  { %1154 = shalt.err (!%p1151_p11)
}
 0x394   :  { %s1180_s9 = smov 256  }
 0x395   :  { %978 = dma.vmem_to_hbm [thread:$0]  %s973_s23, 512, %s1639_s7, [#allocation4], %s1180_s9, %s1180_s9, %s1171_s2  }
 0x396   :  { %1161 = dma.done.wait [#allocation4], 512  }
 0x397   :  { %1162 = vsyncadd [#allocation4], 4294966784 }
 0x398   :  { %982 = vsyncpa [#allocation3], 1 }
 0x399   :  { %983 = vsyncpa [#allocation6], 1 }
 0x39a   :  { %984 = vsyncpa [#allocation9], 1 }
 0x39b   :  { %985 = vsyncpa [#allocation4], 1 }

</bundles_post_ra>
